<compile_context>
chip_gen: v7x
topology: tpu7x:2x2x1
jax: 0.10.0
libtpu: 0.0.40
codegen_flags: <defaults>
</compile_context>

<pallas_src>
import functools

import jax
import jax.numpy as jnp
from jax.experimental import pallas as pl
from jax.experimental.pallas import tpu as pltpu


def _round_up(x, m):
    return (x + m - 1) // m * m


def _pick_tile(n_pad):
    # n_pad is always a multiple of 128; prefer larger tiles (past the ~85%
    # HBM-roofline knee) while keeping the (tm, tk) bf16 tile small enough for
    # v7x's 64 MiB VMEM with double buffering.
    for t in (512, 256, 128):
        if n_pad % t == 0:
            return t
    return n_pad


# ------------------- feature-transform kernel: out = X @ W -------------------
def _linear_kernel(x_ref, w_ref, out_ref):
    out_ref[...] = jnp.dot(
        x_ref[...], w_ref[...], preferred_element_type=jnp.float32
    ).astype(out_ref.dtype)


def _linear(x, w, tm):
    n, c_in = x.shape
    fw = w.shape[1]
    cost = pl.CostEstimate(
        flops=2 * n * c_in * fw,
        transcendentals=0,
        bytes_accessed=4 * (n * c_in + c_in * fw + n * fw),
    )
    return pl.pallas_call(
        _linear_kernel,
        out_shape=jax.ShapeDtypeStruct((n, fw), jnp.float32),
        grid_spec=pltpu.PrefetchScalarGridSpec(
            num_scalar_prefetch=0,
            grid=(n // tm,),
            in_specs=[
                pl.BlockSpec((tm, c_in), lambda i: (i, 0)),
                pl.BlockSpec((c_in, fw), lambda i: (0, 0)),
            ],
            out_specs=pl.BlockSpec((tm, fw), lambda i: (i, 0)),
        ),
        compiler_params=pltpu.CompilerParams(
            dimension_semantics=("parallel",),
            vmem_limit_bytes=32 * 1024 * 1024,
        ),
        cost_estimate=cost,
    )(x, w)


# -------------- aggregation kernel: out = (optional relu)(A @ F) --------------
def _agg_kernel(adj_ref, f_ref, out_ref, acc_ref, *, apply_relu):
    k = pl.program_id(1)

    @pl.when(k == 0)
    def _init():
        acc_ref[...] = jnp.zeros_like(acc_ref)

    # Adjacency streamed as bf16 (exact {0,1}); accumulate in f32.
    acc_ref[...] += jnp.dot(
        adj_ref[...].astype(jnp.float32),
        f_ref[...],
        preferred_element_type=jnp.float32,
    )

    @pl.when(k == pl.num_programs(1) - 1)
    def _finalize():
        r = acc_ref[...]
        if apply_relu:
            r = jnp.maximum(r, 0.0)
        out_ref[...] = r.astype(out_ref.dtype)


def _aggregate(adj, feat, tm, tk, *, apply_relu):
    n = adj.shape[0]
    fw = feat.shape[1]
    cost = pl.CostEstimate(
        flops=2 * n * n * fw,
        transcendentals=0,
        bytes_accessed=(
            n * n * adj.dtype.itemsize      # adjacency streamed once
            + (n // tm) * n * fw * 4        # feature slab re-read per row tile
            + n * fw * 4                    # output
        ),
    )
    kernel = functools.partial(_agg_kernel, apply_relu=apply_relu)
    return pl.pallas_call(
        kernel,
        out_shape=jax.ShapeDtypeStruct((n, fw), jnp.float32),
        grid_spec=pltpu.PrefetchScalarGridSpec(
            num_scalar_prefetch=0,
            grid=(n // tm, n // tk),
            in_specs=[
                pl.BlockSpec((tm, tk), lambda i, k: (i, k)),   # adjacency tile
                pl.BlockSpec((tk, fw), lambda i, k: (k, 0)),   # feature k-slab
            ],
            out_specs=pl.BlockSpec((tm, fw), lambda i, k: (i, 0)),
            scratch_shapes=[pltpu.VMEM((tm, fw), jnp.float32)],
        ),
        compiler_params=pltpu.CompilerParams(
            dimension_semantics=("parallel", "arbitrary"),
            vmem_limit_bytes=32 * 1024 * 1024,
        ),
        cost_estimate=cost,
    )(adj, feat)


def vanilla_gnn_forward(x, adjacency, w1, w2):
    """x: [N, Cin], adjacency: [N, N] dense, w1: [H, Cin], w2: [Cout, H] (torch layout)."""
    n, _ = x.shape
    h_dim = w1.shape[0]
    c_out = w2.shape[0]

    n_pad = _round_up(n, 128)
    tm = _pick_tile(n_pad)
    tk = tm
    h_pad = _round_up(h_dim, 128)   # lane-dense hidden width
    c_pad = _round_up(c_out, 128)   # lane-dense output width

    # Zero-pad node dim (extra rows/cols of A are zero -> no effect on real rows)
    # and feature widths (padded weight columns are zero -> padded features are 0).
    x_p = jnp.pad(x.astype(jnp.float32), ((0, n_pad - n), (0, 0)))
    adj_p = jnp.pad(adjacency, ((0, n_pad - n), (0, n_pad - n))).astype(jnp.bfloat16)
    w1_p = jnp.pad(w1.T.astype(jnp.float32), ((0, 0), (0, h_pad - h_dim)))
    w2_p = jnp.pad(w2.T.astype(jnp.float32), ((0, h_pad - h_dim), (0, c_pad - c_out)))

    xw1 = _linear(x_p, w1_p, tm)                            # [n_pad, h_pad]
    h = _aggregate(adj_p, xw1, tm, tk, apply_relu=True)     # relu(A @ (X W1))
    hw2 = _linear(h, w2_p, tm)                              # [n_pad, c_pad]
    out = _aggregate(adj_p, hw2, tm, tk, apply_relu=False)  # A @ (h W2)
    return out[:n, :c_out]


def reference_forward(x, adjacency, w1, w2):
    h = adjacency @ (x @ w1.T)
    h = jnp.maximum(h, 0.0)
    return adjacency @ (h @ w2.T)


if __name__ == "__main__":
    key = jax.random.PRNGKey(0)
    k_x, k_adj, k_w1, k_w2 = jax.random.split(key, 4)

    # Small shapes consistent with the module.
    num_nodes = 128
    in_channels = 16
    hidden_channels = 32
    out_channels = 8

    # Node features.
    x = jax.random.normal(k_x, (num_nodes, in_channels), dtype=jnp.float32)

    # Dense adjacency with self-loops (as in fit/test: to_dense_adj + eye).
    adj = (jax.random.uniform(k_adj, (num_nodes, num_nodes)) < 0.05).astype(jnp.float32)
    adj = jnp.clip(adj + jnp.eye(num_nodes, dtype=jnp.float32), 0.0, 1.0)

    # Deterministic Linear weights (torch layout: [out_features, in_features]),
    # uniform(-1/sqrt(fan_in), 1/sqrt(fan_in)) like torch.nn.Linear default.
    b1 = 1.0 / jnp.sqrt(jnp.float32(in_channels))
    b2 = 1.0 / jnp.sqrt(jnp.float32(hidden_channels))
    w1 = jax.random.uniform(k_w1, (hidden_channels, in_channels),
                            minval=-b1, maxval=b1, dtype=jnp.float32)
    w2 = jax.random.uniform(k_w2, (out_channels, hidden_channels),
                            minval=-b2, maxval=b2, dtype=jnp.float32)

    out = vanilla_gnn_forward(x, adj, w1, w2)
    out = jax.block_until_ready(out)

    ref = reference_forward(x, adj, w1, w2)
    assert out.shape == (num_nodes, out_channels)
    assert jnp.allclose(out, ref, atol=1e-4, rtol=1e-4), "mismatch vs reference"

    print("KERNEL_OK")
</pallas_src>

<mosaic_0001>
module attributes {stable_mosaic.version = 11 : i64} {
  func.func @_linear_kernel(%arg0: i32, %arg1: memref<128x16xf32, #tpu.memory_space<vmem>>, %arg2: memref<16x128xf32, #tpu.memory_space<vmem>>, %arg3: memref<128x128xf32, #tpu.memory_space<vmem>>) attributes {dimension_semantics = [#tpu.dimension_semantics<parallel>], iteration_bounds = array<i64: 1>, scalar_prefetch = 0 : i64, scratch_operands = 0 : i64, tpu.core_type = #tpu.core_type<tc>, window_params = [{transform_indices = @transform_0, window_bounds = array<i64: 128, 16>}, {pipeline_mode = #tpu.pipeline_mode<synchronous>, transform_indices = @transform_1, window_bounds = array<i64: 16, 128>}, {transform_indices = @transform_2, window_bounds = array<i64: 128, 128>}]} {
    %c0 = arith.constant 0 : index
    %c0_0 = arith.constant 0 : index
    %0 = vector.load %arg1[%c0, %c0_0] : memref<128x16xf32, #tpu.memory_space<vmem>>, vector<128x16xf32>
    %c0_1 = arith.constant 0 : index
    %c0_2 = arith.constant 0 : index
    %1 = vector.load %arg2[%c0_1, %c0_2] : memref<16x128xf32, #tpu.memory_space<vmem>>, vector<16x128xf32>
    %cst = arith.constant dense<0.000000e+00> : vector<128x128xf32>
    %2 = tpu.matmul %0, %1, %cst {dimension_numbers = #tpu.dot_dimension_numbers<[1], [0], [0], [1], [0, 0, 1, 1], [], []>} : vector<128x16xf32>, vector<16x128xf32>, vector<128x128xf32> -> vector<128x128xf32>
    %c0_3 = arith.constant 0 : index
    %c0_4 = arith.constant 0 : index
    %3 = vector.load %arg3[%c0_3, %c0_4] : memref<128x128xf32, #tpu.memory_space<vmem>>, vector<128x128xf32>
    tpu.vector_store %arg3[%c0_3, %c0_4], %2 {strides = array<i32>} : memref<128x128xf32, #tpu.memory_space<vmem>>, vector<128x128xf32>,
    return
  }
  func.func @transform_0(%arg0: i32) -> (i32, i32) {
    %c0_i32 = arith.constant 0 : i32
    %c0_i32_0 = arith.constant 0 : i32
    return %arg0, %c0_i32 : i32, i32
  }
  func.func @transform_1(%arg0: i32) -> (i32, i32) {
    %c0_i32 = arith.constant 0 : i32
    %c0_i32_0 = arith.constant 0 : i32
    %c0_i32_1 = arith.constant 0 : i32
    return %c0_i32, %c0_i32_0 : i32, i32
  }
  func.func @transform_2(%arg0: i32) -> (i32, i32) {
    %c0_i32 = arith.constant 0 : i32
    %c0_i32_0 = arith.constant 0 : i32
    return %arg0, %c0_i32 : i32, i32
  }
}

</mosaic_0001>

<bundles_post_ra>
// kernel: tpu_custom_call.1
= control target key start
LH: loop header
LB: loop body
LE: loop exit
PB: predicated region body
PF: predicated region fallthrough
CT: control target
= control target key end

     0   :  { %vm30_vm0 = vcmask 130048   ;;  %s451_s0 = inlined_call_operand.vmem [shape: f32[128,16], index: 0, kind: input, shape index: {}]   ;;  %s452_s1 = inlined_call_operand.vmem [shape: f32[16,128], index: 1, kind: input, shape index: {}]   ;;  %s453_s2 = inlined_call_operand.hbm [shape: f32[128,128], index: 2, kind: output, shape index: {}]  }
   0x1   :  { %v28_v0 = vld [vmem:[%s452_s1] sm:$0xff]  ;;  %v29_v1 = vld [vmem:[%s452_s1 + $0x8] sm:$0xff]  ;;  %v14_v7 = vld [vmem:[%s451_s0 + $0x10] sm:$0xff] }
   0x2   :  { %v12_v2 = vld [vmem:[%s451_s0] sm:$0xff]  ;;  %v318_v3 = vpack.c.bf16 %v29_v1, %v28_v0  ;;  %v13_v5 = vld [vmem:[%s451_s0 + $0x8] sm:$0xff]  ;;  %v22_v8 = vld [vmem:[%s451_s0 + $0x50] sm:$0xff] }
   0x3   :  { %294 = vmatprep.mubr.msk.f32.mxu0 %vm30_vm0, %v12_v2  ;;  %v20_v4 = vld [vmem:[%s451_s0 + $0x40] sm:$0xff]  ;;  %v21_v6 = vld [vmem:[%s451_s0 + $0x48] sm:$0xff] }
   0x4   :  { %306 = vmatprep.mubr.msk.f32.mxu1 %vm30_vm0, %v20_v4  ;;  %319 = vmatprep.subr.bf16.mxu0 %v318_v3 }
   0x5   :  { %322 = vmatprep.subr.bf16.mxu1 %v318_v3  ;;  %321 = vmatpush3.bf16.msra.mxu0 %v318_v3 }
   0x6   :  { %323 = vmatpush3.bf16.msra.mxu1 %v318_v3 }
   0x7   :  { %7 = vsyncpa [#allocation3], 0  ;;  %v15_v9 = vld [vmem:[%s451_s0 + $0x18] sm:$0xff]  ;;  %v16_v11 = vld [vmem:[%s451_s0 + $0x20] sm:$0xff] }
   0x8   :  { %295 = vmatmul.mubr.msk.f32.vlgmr.msra.gmra.mrb[0].mxu0 %vm30_vm0, %v13_v5  ;;  %v23_v10 = vld [vmem:[%s451_s0 + $0x58] sm:$0xff]  ;;  %v24_v12 = vld [vmem:[%s451_s0 + $0x60] sm:$0xff]  ;;  %v17_v13 = vld [vmem:[%s451_s0 + $0x28] sm:$0xff] }
   0x9   :  { %307 = vmatmul.mubr.msk.f32.vlgmr.msra.gmra.mrb[0].mxu1 %vm30_vm0, %v21_v6  ;;  %297 = vmatprep.mubr.msk.f32.mxu0 %vm30_vm0, %v14_v7  ;;  %v25_v14 = vld [vmem:[%s451_s0 + $0x68] sm:$0xff]  ;;  %v18_v15 = vld [vmem:[%s451_s0 + $0x30] sm:$0xff]  ;;  %v19_v17 = vld [vmem:[%s451_s0 + $0x38] sm:$0xff] }
   0xa   :  { %309 = vmatprep.mubr.msk.f32.mxu1 %vm30_vm0, %v22_v8  ;;  %v26_v16 = vld [vmem:[%s451_s0 + $0x70] sm:$0xff]  ;;  %v27_v18 = vld [vmem:[%s451_s0 + $0x78] sm:$0xff]  ;;  %s351_s0 = smov [#allocation2]  }
   0xb   :  { %s245_s16 = sshll.u32 %s351_s0, 4  ;;  %s246_s16 = int_to_ptr.vmem [resolvable:$true] %s245_s16 }
   0xc   :  { %298 = vmatmul.mubr.msk.f32.gmra.mrb[2].mxu0 %vm30_vm0, %v15_v9  ;;  %s327_s17 = scalar_lea.vmem %s246_s16, 2048  ;;  %p332_p1 = scmp.lt.s32.totalorder %s246_s16, %s246_s16 }
   0xd   :  { %310 = vmatmul.mubr.msk.f32.gmra.mrb[2].mxu1 %vm30_vm0, %v23_v10  ;;  %300 = vmatprep.mubr.msk.f32.mxu0 %vm30_vm0, %v16_v11  ;;  %p328_p0 = scmp.ne.s32.totalorder %s246_s16, %s327_s17  ;;  %p333_p2 = scmp.lt.s32.totalorder %s327_s17, %s327_s17 }
   0xe   :  { %312 = vmatprep.mubr.msk.f32.mxu1 %vm30_vm0, %v24_v12 }
   0xf   :  { %p334_p3 = por %p333_p2, %p332_p1 }
  0x10   :  { %301 = vmatmul.mubr.msk.f32.gmra.mrb[4].mxu0 %vm30_vm0, %v17_v13 }
  0x11   :  { %313 = vmatmul.mubr.msk.f32.gmra.mrb[4].mxu1 %vm30_vm0, %v25_v14  ;;  %303 = vmatprep.mubr.msk.f32.mxu0 %vm30_vm0, %v18_v15  ;;  %p335_p4 = pnand %p334_p3, %p328_p0 }
  0x12   :  { %315 = vmatprep.mubr.msk.f32.mxu1 %vm30_vm0, %v26_v16 }
  0x14   :  { %304 = vmatmul.mubr.msk.f32.gmra.mrb[6].mxu0 %vm30_vm0, %v19_v17 }
  0x15   :  { %316 = vmatmul.mubr.msk.f32.gmra.mrb[6].mxu1 %vm30_vm0, %v27_v18 }
  0xdb   :  { %v296_v19 = vpop.f32.mrb[0].mxu0 }
  0xdc   :  { %v308_v20 = vpop.f32.mrb[0].mxu1  ;;  %225 = vst [vmem:[#allocation2 + $0x8] sm:$0xff] %v296_v19  ;;  %v145_v21 = vpop.f32.mrb[1].mxu0 }
  0xdd   :  { %233 = vst [vmem:[#allocation2 + $0x48] sm:$0xff] %v308_v20  ;;  %v185_v22 = vpop.f32.mrb[1].mxu1  ;;  %224 = vst [vmem:[#allocation2] sm:$0xff] %v145_v21 }
  0xde   :  { %232 = vst [vmem:[#allocation2 + $0x40] sm:$0xff] %v185_v22 }
  0xdf   :  { %v299_v23 = vpop.f32.mrb[2].mxu0 }
  0xe0   :  { %v311_v24 = vpop.f32.mrb[2].mxu1  ;;  %227 = vst [vmem:[#allocation2 + $0x18] sm:$0xff] %v299_v23  ;;  %v155_v25 = vpop.f32.mrb[3].mxu0 }
  0xe1   :  { %235 = vst [vmem:[#allocation2 + $0x58] sm:$0xff] %v311_v24  ;;  %v195_v26 = vpop.f32.mrb[3].mxu1  ;;  %226 = vst [vmem:[#allocation2 + $0x10] sm:$0xff] %v155_v25 }
  0xe2   :  { %234 = vst [vmem:[#allocation2 + $0x50] sm:$0xff] %v195_v26 }
  0xe3   :  { %v302_v27 = vpop.f32.mrb[4].mxu0 }
  0xe4   :  { %v314_v28 = vpop.f32.mrb[4].mxu1  ;;  %229 = vst [vmem:[#allocation2 + $0x28] sm:$0xff] %v302_v27  ;;  %v165_v29 = vpop.f32.mrb[5].mxu0 }
  0xe5   :  { %237 = vst [vmem:[#allocation2 + $0x68] sm:$0xff] %v314_v28  ;;  %v205_v30 = vpop.f32.mrb[5].mxu1  ;;  %228 = vst [vmem:[#allocation2 + $0x20] sm:$0xff] %v165_v29 }
  0xe6   :  { %236 = vst [vmem:[#allocation2 + $0x60] sm:$0xff] %v205_v30 }
  0xe7   :  { %v305_v31 = vpop.f32.mrb[6].mxu0 }
  0xe8   :  { %v317_v32 = vpop.f32.mrb[6].mxu1  ;;  %231 = vst [vmem:[#allocation2 + $0x38] sm:$0xff] %v305_v31  ;;  %v175_v33 = vpop.f32.mrb[7].mxu0 }
  0xe9   :  { %239 = vst [vmem:[#allocation2 + $0x78] sm:$0xff] %v317_v32  ;;  %v215_v34 = vpop.f32.mrb[7].mxu1  ;;  %230 = vst [vmem:[#allocation2 + $0x30] sm:$0xff] %v175_v33 }
  0xea   :  { %238 = vst [vmem:[#allocation2 + $0x70] sm:$0xff] %v215_v34 }
  0xeb   :  { %338 = shalt.err (!%p335_p4)
}
  0xec   :  { %s339_s19 = scalar_lea.hbm %s453_s2, 2048 }
  0xed   :  { %p340_p5 = scmp.ne.s32.totalorder %s453_s2, %s339_s19  ;;  %p343_p6 = scmp.lt.u32.totalorder %s339_s19, %s453_s2 }
  0xef   :  { %p345_p7 = pnand %p343_p6, %p340_p5 }
  0xf1   :  { %348 = shalt.err (!%p345_p7)
}
  0xf2   :  { %s352_s24 = smov 128   ;;  %s353_s25 = smov 8  }
  0xf3   :  { %251 = dma.vmem_to_hbm [thread:$0]  %s246_s16, 2048, %s453_s2, [#allocation3], %s352_s24, %s352_s24, %s353_s25  }
  0xf4   :  { %349 = dma.done.wait [#allocation3], 2048  }
  0xf5   :  { %350 = vsyncadd [#allocation3], 4294965248 }
  0xf6   :  { %255 = vsyncpa [#allocation3], 1 }

</bundles_post_ra>
